<compile_context>
chip_gen: v5e
topology: v5e:2x2
jax: 0.10.0
libtpu: 0.0.40
codegen_flags: <defaults>
</compile_context>

<pallas_src>
import functools

import jax
import jax.numpy as jnp
from jax.experimental import pallas as pl
from jax.experimental.pallas import tpu as pltpu


def _window_sums(series_f32, kernel_size, n_pos):
    """series_f32: (TB, n_pos + K - 1, TC) f32. Returns (TB, n_pos, TC) f32 where
    out[:, i, :] = sum_{j<K} series[:, i + j, :].

    Streaming doubling: walk K's bits LSB->MSB keeping only the current power-of-two
    width sums (`cur`) and the accumulator (`acc`) alive."""
    K = kernel_size
    cur = series_f32          # width-1 sums
    acc = None
    w = 1
    off = 0
    while True:
        if K & w:
            piece = cur[:, off:off + n_pos, :]
            acc = piece if acc is None else acc + piece
            off += w
        if (w << 1) > K:
            break
        nlen = cur.shape[1] - w
        cur = cur[:, :nlen, :] + cur[:, w:w + nlen, :]
        w <<= 1
    return acc


def _moving_avg_kernel(x_ref, o_ref, *, kernel_size, stride, pad, l_in, l_out):
    # x_ref : (TB, L, TC)      a batch tile x channel tile
    # o_ref : (TB, L_out, TC)
    K, S = kernel_size, stride
    tb, _, tc = x_ref.shape

    x = x_ref[...].astype(jnp.float32)

    # 1) Replicate-padded series built as a value (no scratch store/reload, no padded HBM copy).
    if pad > 0:
        first = jnp.broadcast_to(x[:, 0:1, :], (tb, pad, tc))
        last = jnp.broadcast_to(x[:, l_in - 1:l_in, :], (tb, pad, tc))
        series = jnp.concatenate([first, x, last], axis=1)
    else:
        series = x

    # 2) Width-K window sums via streaming doubling partial sums (f32 accumulation).
    n_pos = (l_out - 1) * S + 1
    series = series[:, :n_pos + K - 1, :]
    sums = _window_sums(series, K, n_pos)

    mean = sums * (1.0 / K)
    if S > 1:
        mean = mean[:, ::S, :]  # single strided downsample; sums above were contiguous
    o_ref[...] = mean.astype(o_ref.dtype)


def moving_avg(x, kernel_size, stride, *, block_batch=None):
    """x: (B, L, C) -> (B, L_out, C); replicate-padded sliding mean along the time axis."""
    B, L, C = x.shape
    K, S = int(kernel_size), int(stride)
    pad = (K - 1) // 2
    L_pad = L + 2 * pad
    L_out = (L_pad - K) // S + 1
    assert L_out >= 1

    itemsize = jnp.dtype(x.dtype).itemsize

    # Generation-aware VMEM budget.
    try:
        info = pltpu.get_tpu_info()
        vmem_cap = int(getattr(info, "vmem_capacity_bytes", 64 * 1024 * 1024))
    except Exception:
        vmem_cap = 64 * 1024 * 1024            # assume the smallest (v7x per-core)
    big_vmem = vmem_cap >= 96 * 1024 * 1024     # v5e / v6e 128 MiB parts
    soft = (12 if big_vmem else 8) * 1024 * 1024
    ceiling = min(vmem_cap * 3 // 4, 64 * 1024 * 1024)

    def footprint(tb, tc):
        # double-buffered in/out blocks + ~4 live f32 temporaries over the padded length
        return (2 * tb * L * tc * itemsize
                + 2 * tb * L_out * tc * itemsize
                + 4 * tb * L_pad * tc * 4)

    # Channel tile (lane axis, halo-free).
    if C <= 128 or footprint(1, C) <= soft:
        TC = C
    else:
        per_chan = footprint(1, 1)
        TC = int(min(C, max(128, ((soft // per_chan) // 128) * 128)))
    nC = pl.cdiv(C, TC)

    # Batch tile: pack several batch rows per grid step to amortize per-step overhead.
    if block_batch is not None:
        TB = max(1, min(int(block_batch), B))
    else:
        TB = int(max(1, min(B, soft // max(1, footprint(1, TC)))))
    while footprint(TB, TC) > ceiling and TB > 1:
        TB = max(1, TB // 2)
    nB = pl.cdiv(B, TB)

    vmem_need = footprint(TB, TC)
    if vmem_need > ceiling:
        # TODO(synk): halo'd time tiling for very long L with small C.
        raise ValueError(
            f"moving_avg: minimal block ({vmem_need} B) exceeds the VMEM budget "
            f"({ceiling} B); time tiling with a K-1 halo is not implemented yet.")
    vmem_limit = None
    if vmem_need > 8 * 1024 * 1024:
        vmem_limit = int(min(max(2 * vmem_need, 32 * 1024 * 1024), ceiling))

    kernel = functools.partial(
        _moving_avg_kernel,
        kernel_size=K, stride=S, pad=pad, l_in=L, l_out=L_out,
    )

    cost = pl.CostEstimate(
        flops=B * L_out * C * K,
        transcendentals=0,
        bytes_accessed=(B * L * C + B * L_out * C) * itemsize,
    )

    return pl.pallas_call(
        kernel,
        out_shape=jax.ShapeDtypeStruct((B, L_out, C), x.dtype),
        grid_spec=pltpu.PrefetchScalarGridSpec(
            num_scalar_prefetch=0,
            grid=(nB, nC),
            in_specs=[pl.BlockSpec((TB, L, TC), lambda b, c: (b, 0, c))],
            out_specs=pl.BlockSpec((TB, L_out, TC), lambda b, c: (b, 0, c)),
        ),
        compiler_params=pltpu.CompilerParams(
            dimension_semantics=("parallel", "parallel"),
            vmem_limit_bytes=vmem_limit,
        ),
        cost_estimate=cost,
    )(x)


def _reference(x, kernel_size, stride):
    # Pure-JAX reference mirroring the PyTorch module.
    B, L, C = x.shape
    pad = (kernel_size - 1) // 2
    front = jnp.broadcast_to(x[:, 0:1, :], (B, pad, C))
    end = jnp.broadcast_to(x[:, L - 1:L, :], (B, pad, C))
    xp = jnp.concatenate([front, x, end], axis=1)
    L_out = (xp.shape[1] - kernel_size) // stride + 1
    outs = []
    for t in range(L_out):
        outs.append(jnp.mean(xp[:, t * stride:t * stride + kernel_size, :], axis=1))
    return jnp.stack(outs, axis=1)


if __name__ == "__main__":
    key = jax.random.PRNGKey(0)

    # Main config (matches the module / prior test).
    kernel_size, stride = 5, 1
    B, L, C = 2, 16, 8
    x = jax.random.normal(key, (B, L, C), dtype=jnp.float32)
    out = jax.block_until_ready(moving_avg(x, kernel_size, stride))
    ref = _reference(x, kernel_size, stride)
    assert out.shape == ref.shape, (out.shape, ref.shape)
    assert jnp.max(jnp.abs(out - ref)) < 1e-5

    # Autoformer's usual kernel_size=25 exercises the streaming doubling-sum path.
    x2 = jax.random.normal(jax.random.PRNGKey(1), (2, 96, 8), dtype=jnp.float32)
    out2 = jax.block_until_ready(moving_avg(x2, 25, 1))
    ref2 = _reference(x2, 25, 1)
    assert out2.shape == ref2.shape, (out2.shape, ref2.shape)
    assert jnp.max(jnp.abs(out2 - ref2)) < 1e-5

    # Stride > 1, even K, and a partial batch block (B=3 with TB=2) to exercise masking.
    x3 = jax.random.normal(jax.random.PRNGKey(2), (3, 16, 8), dtype=jnp.float32)
    out3 = jax.block_until_ready(moving_avg(x3, 4, 2, block_batch=2))
    ref3 = _reference(x3, 4, 2)
    assert out3.shape == ref3.shape, (out3.shape, ref3.shape)
    assert jnp.max(jnp.abs(out3 - ref3)) < 1e-5

    print("KERNEL_OK")
</pallas_src>

<mosaic_0001>
module attributes {stable_mosaic.version = 11 : i64} {
  func.func @_moving_avg_kernel(%arg0: i32, %arg1: i32, %arg2: memref<2x16x8xf32, #tpu.memory_space<vmem>>, %arg3: memref<2x16x8xf32, #tpu.memory_space<vmem>>) attributes {dimension_semantics = [#tpu.dimension_semantics<parallel>, #tpu.dimension_semantics<parallel>], iteration_bounds = array<i64: 1, 1>, scalar_prefetch = 0 : i64, scratch_operands = 0 : i64, tpu.core_type = #tpu.core_type<tc>, window_params = [{transform_indices = @transform_0, window_bounds = array<i64: 2, 16, 8>}, {transform_indices = @transform_1, window_bounds = array<i64: 2, 16, 8>}]} {
    %c0 = arith.constant 0 : index
    %c0_0 = arith.constant 0 : index
    %c0_1 = arith.constant 0 : index
    %0 = vector.load %arg2[%c0, %c0_0, %c0_1] : memref<2x16x8xf32, #tpu.memory_space<vmem>>, vector<2x16x8xf32>
    %1 = vector.extract_strided_slice %0 {offsets = [0, 0, 0], sizes = [2, 1, 8], strides = [1, 1, 1]} : vector<2x16x8xf32> to vector<2x1x8xf32>
    %2 = vector.shape_cast %1 : vector<2x1x8xf32> to vector<2x1x8xf32>
    %3 = vector.broadcast %2 : vector<2x1x8xf32> to vector<2x2x8xf32>
    %4 = vector.extract_strided_slice %0 {offsets = [0, 15, 0], sizes = [2, 1, 8], strides = [1, 1, 1]} : vector<2x16x8xf32> to vector<2x1x8xf32>
    %5 = vector.shape_cast %4 : vector<2x1x8xf32> to vector<2x1x8xf32>
    %6 = vector.broadcast %5 : vector<2x1x8xf32> to vector<2x2x8xf32>
    %7 = tpu.concatenate %3, %0, %6 in 1 : vector<2x2x8xf32>, vector<2x16x8xf32>, vector<2x2x8xf32> -> vector<2x20x8xf32>
    %8 = vector.extract_strided_slice %7 {offsets = [0, 0, 0], sizes = [2, 16, 8], strides = [1, 1, 1]} : vector<2x20x8xf32> to vector<2x16x8xf32>
    %9 = vector.extract_strided_slice %7 {offsets = [0, 0, 0], sizes = [2, 19, 8], strides = [1, 1, 1]} : vector<2x20x8xf32> to vector<2x19x8xf32>
    %10 = vector.extract_strided_slice %7 {offsets = [0, 1, 0], sizes = [2, 19, 8], strides = [1, 1, 1]} : vector<2x20x8xf32> to vector<2x19x8xf32>
    %11 = arith.addf %9, %10 : vector<2x19x8xf32>
    %12 = vector.extract_strided_slice %11 {offsets = [0, 0, 0], sizes = [2, 17, 8], strides = [1, 1, 1]} : vector<2x19x8xf32> to vector<2x17x8xf32>
    %13 = vector.extract_strided_slice %11 {offsets = [0, 2, 0], sizes = [2, 17, 8], strides = [1, 1, 1]} : vector<2x19x8xf32> to vector<2x17x8xf32>
    %14 = arith.addf %12, %13 : vector<2x17x8xf32>
    %15 = vector.extract_strided_slice %14 {offsets = [0, 1, 0], sizes = [2, 16, 8], strides = [1, 1, 1]} : vector<2x17x8xf32> to vector<2x16x8xf32>
    %16 = arith.addf %8, %15 : vector<2x16x8xf32>
    %cst = arith.constant 2.000000e-01 : f32
    %17 = vector.broadcast %cst : f32 to vector<2x16x8xf32>
    %18 = arith.mulf %16, %17 : vector<2x16x8xf32>
    %c0_2 = arith.constant 0 : index
    %c0_3 = arith.constant 0 : index
    %c0_4 = arith.constant 0 : index
    %19 = vector.load %arg3[%c0_2, %c0_3, %c0_4] : memref<2x16x8xf32, #tpu.memory_space<vmem>>, vector<2x16x8xf32>
    tpu.vector_store %arg3[%c0_2, %c0_3, %c0_4], %18 {strides = array<i32>} : memref<2x16x8xf32, #tpu.memory_space<vmem>>, vector<2x16x8xf32>,
    return
  }
  func.func @transform_0(%arg0: i32, %arg1: i32) -> (i32, i32, i32) {
    %c0_i32 = arith.constant 0 : i32
    %c0_i32_0 = arith.constant 0 : i32
    return %arg0, %c0_i32, %arg1 : i32, i32, i32
  }
  func.func @transform_1(%arg0: i32, %arg1: i32) -> (i32, i32, i32) {
    %c0_i32 = arith.constant 0 : i32
    %c0_i32_0 = arith.constant 0 : i32
    return %arg0, %c0_i32, %arg1 : i32, i32, i32
  }
}

</mosaic_0001>

<bundles_post_ra>
// kernel: tpu_custom_call.1
= control target key start
LH: loop header
LB: loop body
LE: loop exit
PB: predicated region body
PF: predicated region fallthrough
CT: control target
= control target key end

     0   :  { %vm20_vm0 = vcmask 1041408   ;;  %vm41_vm1 = vcmask 1046528   ;;  %vm70_vm2 = vcmask 1045504   ;;  %vm121_vm3 = vcmask 64512   ;;  %s182_s0 = inlined_call_operand.vmem [shape: f32[2,16,8], index: 0, kind: input, shape index: {}]   ;;  %s183_s1 = inlined_call_operand.vmem [shape: f32[2,16,8], index: 1, kind: output, shape index: {}]  }
   0x1   :  { %v8_v0 = vld [vmem:[%s182_s0] sm:$0xff]  ;;  %v9_v1 = vld [vmem:[%s182_s0 + $0x8] sm:$0xff]  ;;  %v10_v2 = vld [vmem:[%s182_s0 + $0x10] sm:$0xff] }
   0x2   :  { %v12_v3 = vperm.slane %v8_v0, 0  ;;  %v14_v4 = vperm.slane %v9_v1, 7  ;;  %v21_v5 = vrot.slane %v8_v0, 6  ;;  %v22_v6 = vrot.slane %v9_v1, 6  ;;  %v11_v7 = vld [vmem:[%s182_s0 + $0x18] sm:$0xff] }
   0x3   :  { %v13_v8 = vperm.slane %v10_v2, 0  ;;  %v15_v9 = vperm.slane %v11_v7, 7  ;;  %v24_v10 = vrot.slane %v10_v2, 6  ;;  %v25_v11 = vrot.slane %v11_v7, 6 }
   0x4   :  { %v23_v12 = vsel %vm20_vm0, %v21_v5, %v22_v6  ;;  %v33_v13 = vsel %vm20_vm0, %v12_v3, %v21_v5  ;;  %v35_v14 = vsel %vm20_vm0, %v22_v6, %v14_v4 }
   0x5   :  { %v42_v15 = vrot.slane %v33_v13, 1  ;;  %v43_v16 = vrot.slane %v23_v12, 1  ;;  %v45_v17 = vrot.slane %v35_v14, 1  ;;  %v26_v18 = vsel %vm20_vm0, %v24_v10, %v25_v11 }
   0x6   :  { %v34_v19 = vsel %vm20_vm0, %v13_v8, %v24_v10  ;;  %v36_v20 = vsel %vm20_vm0, %v25_v11, %v15_v9  ;;  %v48_v21 = vrot.slane %v26_v18, 1 }
   0x7   :  { %v44_v22 = vsel %vm41_vm1, %v42_v15, %v43_v16  ;;  %v46_v23 = vsel %vm41_vm1, %v43_v16, %v45_v17  ;;  %v60_v24 = vadd.f32 %v45_v17, %v35_v14  ;;  %v47_v25 = vrot.slane %v34_v19, 1 }
   0x8   :  { %v58_v26 = vadd.f32 %v44_v22, %v33_v13  ;;  %v59_v27 = vadd.f32 %v46_v23, %v23_v12  ;;  %v50_v28 = vrot.slane %v36_v20, 1 }
   0x9   :  { %v74_v29 = vrot.slane %v60_v24, 2  ;;  %v49_v30 = vsel %vm41_vm1, %v47_v25, %v48_v21 }
   0xa   :  { %v71_v31 = vrot.slane %v58_v26, 2  ;;  %v72_v32 = vrot.slane %v59_v27, 2  ;;  %v51_v33 = vsel %vm41_vm1, %v48_v21, %v50_v28  ;;  %v61_v34 = vadd.f32 %v49_v30, %v34_v19 }
   0xb   :  { %v89_v35 = vadd.f32 %v74_v29, %v60_v24  ;;  %v62_v36 = vadd.f32 %v51_v33, %v26_v18  ;;  %v63_v37 = vadd.f32 %v50_v28, %v36_v20 }
   0xc   :  { %v73_v38 = vsel %vm70_vm2, %v71_v31, %v72_v32  ;;  %v75_v39 = vsel %vm70_vm2, %v72_v32, %v74_v29  ;;  %v76_v40 = vrot.slane %v61_v34, 2 }
   0xd   :  { %v87_v41 = vadd.f32 %v73_v38, %v58_v26  ;;  %v88_v42 = vadd.f32 %v75_v39, %v59_v27  ;;  %v102_v43 = vrot.slane %v89_v35, 1  ;;  %v77_v44 = vrot.slane %v62_v36, 2 }
   0xe   :  { %v79_v45 = vrot.slane %v63_v37, 2 }
   0xf   :  { %v99_v46 = vrot.slane %v87_v41, 1  ;;  %v100_v47 = vrot.slane %v88_v42, 1  ;;  %v78_v48 = vsel %vm70_vm2, %v76_v40, %v77_v44 }
  0x10   :  { %v80_v49 = vsel %vm70_vm2, %v77_v44, %v79_v45  ;;  %v90_v50 = vadd.f32 %v78_v48, %v61_v34  ;;  %v92_v51 = vadd.f32 %v79_v45, %v63_v37 }
  0x11   :  { %v101_v52 = vsel %vm41_vm1, %v99_v46, %v100_v47  ;;  %v103_v53 = vsel %vm41_vm1, %v100_v47, %v102_v43  ;;  %v91_v54 = vadd.f32 %v80_v49, %v62_v36 }
  0x12   :  { %v113_v55 = vadd.f32 %v101_v52, %v33_v13  ;;  %v114_v56 = vadd.f32 %v103_v53, %v23_v12  ;;  %v104_v57 = vrot.slane %v90_v50, 1  ;;  %v107_v58 = vrot.slane %v92_v51, 1 }
  0x13   :  { %v105_v59 = vrot.slane %v91_v54, 1 }
  0x14   :  { %v117_v60 = vmul.f32 0.2, %v113_v55  ;;  %v118_v61 = vmul.f32 0.2, %v114_v56 }
  0x15   :  { %v106_v62 = vsel %vm41_vm1, %v104_v57, %v105_v59  ;;  %v108_v63 = vsel %vm41_vm1, %v105_v59, %v107_v58 }
  0x16   :  { %122 = vst.msk [vmem:[%s183_s1] sm:$0xff] %vm121_vm3, %v117_v60  ;;  %v115_v0 = vadd.f32 %v106_v62, %v34_v19  ;;  %v116_v1 = vadd.f32 %v108_v63, %v26_v18 }
  0x17   :  { %123 = vst.msk [vmem:[%s183_s1 + $0x8] sm:$0xff] %vm121_vm3, %v118_v61 }
  0x18   :  { %v119_v2 = vmul.f32 0.2, %v115_v0  ;;  %v120_v3 = vmul.f32 0.2, %v116_v1 }
  0x1a   :  { %124 = vst.msk [vmem:[%s183_s1 + $0x10] sm:$0xff] %vm121_vm3, %v119_v2 }
  0x1b   :  { %125 = vst.msk [vmem:[%s183_s1 + $0x18] sm:$0xff] %vm121_vm3, %v120_v3 }

</bundles_post_ra>
